<compile_context>
chip_gen: v7x
topology: tpu7x:2x2x1
jax: 0.10.0
libtpu: 0.0.40
codegen_flags: <defaults>
</compile_context>

<pallas_src>
import functools

import jax
import jax.numpy as jnp
from jax.experimental import pallas as pl
from jax.experimental.pallas import tpu as pltpu

LANE = 128
SUBLANE = 8            # f32 sublane quantum (x is streamed as f32)
NEG_INF = -1e30        # drives padded logit columns out of the softmax normalizer


def _round_up(n, m):
    return ((n + m - 1) // m) * m


def dnn_kernel(x_ref, w1_ref, b1_ref, w2_ref, b2_ref, out_ref):
    # x_ref : (TB, D)        f32   (streamed per grid step; cast to bf16 here)
    # w1_ref: (D, MID_P)     bf16  (resident)
    # b1_ref: (1, MID_P)     f32   (resident)
    # w2_ref: (MID_P, OUT_P) bf16  (resident)
    # b2_ref: (1, OUT_P)     f32   (resident; padded cols = -1e30)
    # out_ref:(TB, OUT_P)    f32   (lane-dense store; caller slices [:, :10])

    # fc1 (MXU, bf16 inputs, f32 accumulation) + bias + ReLU in f32.
    # The f32->bf16 cast happens in-kernel (VPU) instead of a separate XLA pass.
    x_bf16 = x_ref[...].astype(jnp.bfloat16)
    h = jnp.dot(x_bf16, w1_ref[...], preferred_element_type=jnp.float32)
    h = jnp.maximum(h + b1_ref[...], 0.0)

    # fc2 (MXU) + bias; padded hidden cols are exactly 0 and padded w2 rows are
    # 0, so they contribute nothing.
    logits = jnp.dot(h.astype(jnp.bfloat16), w2_ref[...],
                     preferred_element_type=jnp.float32) + b2_ref[...]

    # log_softmax along the feature dim (numerically stable, f32).
    # Padded columns carry -1e30 -> exp underflows to 0, so the normalizer only
    # sees the 10 real logits.  All math is row-independent, which is what makes
    # partial / garbage last-block rows safe.
    m = jnp.max(logits, axis=-1, keepdims=True)
    shifted = logits - m
    lse = jnp.log(jnp.sum(jnp.exp(shifted), axis=-1, keepdims=True))
    out_ref[...] = shifted - lse


def prepare_params(w1, b1, w2, b2):
    """One-time parameter prep (hoisted out of the per-call path).

    w1: (mid, in) torch layout, b1: (mid,), w2: (out, mid), b2: (out,).
    Returns lane-padded, transposed, bf16/f32 operands ready for the kernel.
    """
    mid, in_dim = w1.shape
    out_dim, _ = w2.shape
    mid_p = _round_up(mid, LANE)
    out_p = _round_up(out_dim, LANE)

    w1t = jnp.zeros((in_dim, mid_p), jnp.float32).at[:, :mid].set(
        jnp.asarray(w1, jnp.float32).T)
    b1p = jnp.zeros((1, mid_p), jnp.float32).at[:, :mid].set(
        jnp.asarray(b1, jnp.float32))
    w2t = jnp.zeros((mid_p, out_p), jnp.float32).at[:mid, :out_dim].set(
        jnp.asarray(w2, jnp.float32).T)
    b2p = jnp.full((1, out_p), NEG_INF, jnp.float32).at[:, :out_dim].set(
        jnp.asarray(b2, jnp.float32))

    params = (w1t.astype(jnp.bfloat16), b1p, w2t.astype(jnp.bfloat16), b2p)
    return params, out_dim


def _choose_batch_tile(B, tb):
    """Pick the batch tile (static Python ints).

    Cap at `tb`, round to the sublane quantum, and — when the batch is large
    enough — force at least 2 grid steps so both v7x TensorCores get work.
    """
    tb_eff = min(tb, _round_up(B, SUBLANE))
    if pl.cdiv(B, tb_eff) == 1 and B > SUBLANE:
        tb_eff = _round_up(pl.cdiv(B, 2), SUBLANE)
    return max(SUBLANE, tb_eff)


@functools.partial(jax.jit, static_argnames=("out_dim", "tb"))
def dnn_forward(x_nchw, w1t, b1, w2t, b2, *, out_dim, tb=1024):
    """x_nchw: (B, C, H, W). Params come from prepare_params().
    Returns (B, out_dim) log-probabilities (f32)."""
    B = x_nchw.shape[0]
    x2d = x_nchw.reshape(B, -1)          # torch.flatten(x, 1); stays f32
    in_dim = x2d.shape[1]
    mid_p = w1t.shape[1]
    out_p = w2t.shape[1]

    tb_eff = _choose_batch_tile(B, tb)
    grid = (pl.cdiv(B, tb_eff),)          # partial last block: reads past the
                                          # end are garbage rows, writes masked.

    # VMEM @ TB=1024, f32 x: 2*(1024*784*4) + 2*(1024*128*4) + ~0.25 MiB weights
    # ~= 7.5 MiB; TB=2048 ~= 15 MiB.  32 MiB scoped limit covers both and is
    # above v5e's 16 MiB default while staying within v7x's 64 MiB physical.
    out_padded = pl.pallas_call(
        dnn_kernel,
        out_shape=jax.ShapeDtypeStruct((B, out_p), jnp.float32),
        grid=grid,
        in_specs=[
            pl.BlockSpec((tb_eff, in_dim), lambda i: (i, 0)),   # x: streamed f32
            pl.BlockSpec((in_dim, mid_p), lambda i: (0, 0)),    # w1: resident
            pl.BlockSpec((1, mid_p), lambda i: (0, 0)),         # b1: resident
            pl.BlockSpec((mid_p, out_p), lambda i: (0, 0)),     # w2: resident
            pl.BlockSpec((1, out_p), lambda i: (0, 0)),         # b2: resident
        ],
        out_specs=pl.BlockSpec((tb_eff, out_p), lambda i: (i, 0)),
        compiler_params=pltpu.CompilerParams(
            dimension_semantics=("parallel",),
            vmem_limit_bytes=32 * 1024 * 1024),
    )(x2d, w1t, b1, w2t, b2)

    # Lane-dense (B,128) store in the kernel; cheap column slice here to match
    # the module's (B, out_dim) output.  Padded columns (10..127) are ~-1e30
    # and must never be consumed as real log-probs.
    return out_padded[:, :out_dim]


if __name__ == "__main__":
    # Module defaults: input_dim=784, mid_dim=100, output_dim=10.
    # Small NCHW input whose flattened size is 784: (2, 4, 14, 14).
    B, C, H, W = 2, 4, 14, 14
    input_dim, mid_dim, output_dim = C * H * W, 100, 10

    key = jax.random.PRNGKey(0)
    kx, kw1, kb1, kw2, kb2 = jax.random.split(key, 5)

    x = jax.random.normal(kx, (B, C, H, W), dtype=jnp.float32)

    # Torch-style parameter shapes: weight = (out, in).
    w1 = jax.random.normal(kw1, (mid_dim, input_dim), dtype=jnp.float32) * 0.05
    b1 = jax.random.normal(kb1, (mid_dim,), dtype=jnp.float32) * 0.05
    w2 = jax.random.normal(kw2, (output_dim, mid_dim), dtype=jnp.float32) * 0.05
    b2 = jax.random.normal(kb2, (output_dim,), dtype=jnp.float32) * 0.05

    params, out_dim = prepare_params(w1, b1, w2, b2)
    out = dnn_forward(x, *params, out_dim=out_dim)
    jax.block_until_ready(out)
    assert out.shape == (B, output_dim)

    # Reference 1: same math as the kernel (bf16 matmuls, f32 accumulation).
    x2d = x.reshape(B, -1)
    xb = x2d.astype(jnp.bfloat16)
    w1b = w1.T.astype(jnp.bfloat16)
    w2b = w2.T.astype(jnp.bfloat16)
    h_bf = jnp.maximum(
        jnp.dot(xb, w1b, preferred_element_type=jnp.float32) + b1, 0.0)
    logits_bf = jnp.dot(h_bf.astype(jnp.bfloat16), w2b,
                        preferred_element_type=jnp.float32) + b2
    ref_bf16 = jax.nn.log_softmax(logits_bf, axis=1)
    assert jnp.allclose(out, ref_bf16, atol=1e-3, rtol=1e-3)

    # Reference 2: module semantics in full f32 (loose tolerance vs bf16 MXU).
    h_f32 = jnp.maximum(x2d @ w1.T + b1, 0.0)
    ref_f32 = jax.nn.log_softmax(h_f32 @ w2.T + b2, axis=1)
    assert jnp.allclose(out, ref_f32, atol=5e-2, rtol=5e-2)

    print("KERNEL_OK")
</pallas_src>

<mosaic_0001>
module attributes {stable_mosaic.version = 11 : i64} {
  func.func @dnn_kernel(%arg0: i32, %arg1: memref<8x784xf32, #tpu.memory_space<vmem>>, %arg2: memref<784x128xbf16, #tpu.memory_space<vmem>>, %arg3: memref<1x128xf32, #tpu.memory_space<vmem>>, %arg4: memref<128x128xbf16, #tpu.memory_space<vmem>>, %arg5: memref<1x128xf32, #tpu.memory_space<vmem>>, %arg6: memref<8x128xf32, #tpu.memory_space<vmem>>) attributes {dimension_semantics = [#tpu.dimension_semantics<parallel>], iteration_bounds = array<i64: 1>, scalar_prefetch = 0 : i64, scratch_operands = 0 : i64, tpu.core_type = #tpu.core_type<tc>, window_params = [{transform_indices = @transform_0, window_bounds = array<i64: 8, 784>}, {pipeline_mode = #tpu.pipeline_mode<synchronous>, transform_indices = @transform_1, window_bounds = array<i64: 784, 128>}, {pipeline_mode = #tpu.pipeline_mode<synchronous>, transform_indices = @transform_2, window_bounds = array<i64: 1, 128>}, {pipeline_mode = #tpu.pipeline_mode<synchronous>, transform_indices = @transform_3, window_bounds = array<i64: 128, 128>}, {pipeline_mode = #tpu.pipeline_mode<synchronous>, transform_indices = @transform_4, window_bounds = array<i64: 1, 128>}, {transform_indices = @transform_5, window_bounds = array<i64: 8, 128>}]} {
    %c0 = arith.constant 0 : index
    %c0_0 = arith.constant 0 : index
    %0 = vector.load %arg1[%c0, %c0_0] : memref<8x784xf32, #tpu.memory_space<vmem>>, vector<8x784xf32>
    %1 = arith.truncf %0 : vector<8x784xf32> to vector<8x784xbf16>
    %c0_1 = arith.constant 0 : index
    %c0_2 = arith.constant 0 : index
    %2 = vector.load %arg2[%c0_1, %c0_2] : memref<784x128xbf16, #tpu.memory_space<vmem>>, vector<784x128xbf16>
    %cst = arith.constant dense<0.000000e+00> : vector<8x128xf32>
    %3 = tpu.matmul %1, %2, %cst {dimension_numbers = #tpu.dot_dimension_numbers<[1], [0], [0], [1], [0, 0, 1, 1], [], []>} : vector<8x784xbf16>, vector<784x128xbf16>, vector<8x128xf32> -> vector<8x128xf32>
    %c0_3 = arith.constant 0 : index
    %c0_4 = arith.constant 0 : index
    %4 = vector.load %arg3[%c0_3, %c0_4] : memref<1x128xf32, #tpu.memory_space<vmem>>, vector<1x128xf32>
    %5 = vector.broadcast %4 : vector<1x128xf32> to vector<8x128xf32>
    %6 = arith.addf %3, %5 : vector<8x128xf32>
    %cst_5 = arith.constant 0.000000e+00 : f32
    %7 = vector.broadcast %cst_5 : f32 to vector<8x128xf32>
    %8 = arith.maximumf %6, %7 : vector<8x128xf32>
    %9 = arith.truncf %8 : vector<8x128xf32> to vector<8x128xbf16>
    %c0_6 = arith.constant 0 : index
    %c0_7 = arith.constant 0 : index
    %10 = vector.load %arg4[%c0_6, %c0_7] : memref<128x128xbf16, #tpu.memory_space<vmem>>, vector<128x128xbf16>
    %cst_8 = arith.constant dense<0.000000e+00> : vector<8x128xf32>
    %11 = tpu.matmul %9, %10, %cst_8 {dimension_numbers = #tpu.dot_dimension_numbers<[1], [0], [0], [1], [0, 0, 1, 1], [], []>} : vector<8x128xbf16>, vector<128x128xbf16>, vector<8x128xf32> -> vector<8x128xf32>
    %c0_9 = arith.constant 0 : index
    %c0_10 = arith.constant 0 : index
    %12 = vector.load %arg5[%c0_9, %c0_10] : memref<1x128xf32, #tpu.memory_space<vmem>>, vector<1x128xf32>
    %13 = vector.broadcast %12 : vector<1x128xf32> to vector<8x128xf32>
    %14 = arith.addf %11, %13 : vector<8x128xf32>
    %cst_11 = arith.constant dense<0xFF800000> : vector<8xf32>
    %15 = vector.multi_reduction <maximumf>, %14, %cst_11 [1] : vector<8x128xf32> to vector<8xf32>
    %16 = vector.shape_cast %15 : vector<8xf32> to vector<8x1xf32>
    %17 = vector.broadcast %16 : vector<8x1xf32> to vector<8x128xf32>
    %18 = arith.subf %14, %17 : vector<8x128xf32>
    %19 = math.exp %18 : vector<8x128xf32>
    %cst_12 = arith.constant dense<0.000000e+00> : vector<8xf32>
    %20 = vector.multi_reduction <add>, %19, %cst_12 [1] : vector<8x128xf32> to vector<8xf32>
    %21 = vector.shape_cast %20 : vector<8xf32> to vector<8x1xf32>
    %22 = math.log %21 : vector<8x1xf32>
    %23 = vector.broadcast %22 : vector<8x1xf32> to vector<8x128xf32>
    %24 = arith.subf %18, %23 : vector<8x128xf32>
    %c0_13 = arith.constant 0 : index
    %c0_14 = arith.constant 0 : index
    %25 = vector.load %arg6[%c0_13, %c0_14] : memref<8x128xf32, #tpu.memory_space<vmem>>, vector<8x128xf32>
    tpu.vector_store %arg6[%c0_13, %c0_14], %24 {strides = array<i32>} : memref<8x128xf32, #tpu.memory_space<vmem>>, vector<8x128xf32>,
    return
  }
  func.func @transform_0(%arg0: i32) -> (i32, i32) {
    %c0_i32 = arith.constant 0 : i32
    %c0_i32_0 = arith.constant 0 : i32
    return %arg0, %c0_i32 : i32, i32
  }
  func.func @transform_1(%arg0: i32) -> (i32, i32) {
    %c0_i32 = arith.constant 0 : i32
    %c0_i32_0 = arith.constant 0 : i32
    %c0_i32_1 = arith.constant 0 : i32
    return %c0_i32, %c0_i32_0 : i32, i32
  }
  func.func @transform_2(%arg0: i32) -> (i32, i32) {
    %c0_i32 = arith.constant 0 : i32
    %c0_i32_0 = arith.constant 0 : i32
    %c0_i32_1 = arith.constant 0 : i32
    return %c0_i32, %c0_i32_0 : i32, i32
  }
  func.func @transform_3(%arg0: i32) -> (i32, i32) {
    %c0_i32 = arith.constant 0 : i32
    %c0_i32_0 = arith.constant 0 : i32
    %c0_i32_1 = arith.constant 0 : i32
    return %c0_i32, %c0_i32_0 : i32, i32
  }
  func.func @transform_4(%arg0: i32) -> (i32, i32) {
    %c0_i32 = arith.constant 0 : i32
    %c0_i32_0 = arith.constant 0 : i32
    %c0_i32_1 = arith.constant 0 : i32
    return %c0_i32, %c0_i32_0 : i32, i32
  }
  func.func @transform_5(%arg0: i32) -> (i32, i32) {
    %c0_i32 = arith.constant 0 : i32
    %c0_i32_0 = arith.constant 0 : i32
    return %arg0, %c0_i32 : i32, i32
  }
}

</mosaic_0001>

<bundles_post_ra>
// kernel: dnn_forward.1
= control target key start
LH: loop header
LB: loop body
LE: loop exit
PB: predicated region body
PF: predicated region fallthrough
CT: control target
= control target key end

     0   :  { %10 = vsyncpa [#allocation3], 0  ;;  %s1274_s0 = inlined_call_operand.vmem [shape: f32[2,784], index: 0, kind: input, shape index: {}]   ;;  %s1275_s1 = inlined_call_operand.hbm [shape: bf16[784,128], index: 1, kind: input, shape index: {}]   ;;  %s1276_s2 = inlined_call_operand.vmem [shape: f32[1,128], index: 2, kind: input, shape index: {}]   ;;  %s1277_s3 = inlined_call_operand.vmem [shape: bf16[128,128], index: 3, kind: input, shape index: {}]   ;;  %s1278_s4 = inlined_call_operand.vmem [shape: f32[1,128], index: 4, kind: input, shape index: {}]   ;;  %s1279_s5 = inlined_call_operand.hbm [shape: f32[2,128], index: 5, kind: output, shape index: {}]  }
   0x1   :  { %11 = vsyncpa [#allocation4], 0  ;;  %s1134_s18 = smov [#allocation2]   ;;  %s1086_s22 = scalar_lea.hbm %s1275_s1, 6272 }
   0x2   :  { %s19_s19 = sshll.u32 %s1134_s18, 4  ;;  %p1087_p0 = scmp.ne.s32.totalorder %s1275_s1, %s1086_s22  ;;  %s20_s19 = int_to_ptr.vmem [resolvable:$true] %s19_s19 }
   0x3   :  { %p1090_p1 = scmp.lt.u32.totalorder %s1086_s22, %s1275_s1 }
   0x5   :  { %p1092_p2 = pnand %p1090_p1, %p1087_p0 }
   0x7   :  { %1095 = shalt.err (!%p1092_p2)
}
   0x8   :  { %s1096_s27 = scalar_lea.vmem %s20_s19, 6272  ;;  %p1101_p4 = scmp.lt.s32.totalorder %s20_s19, %s20_s19 }
   0x9   :  { %p1097_p3 = scmp.ne.s32.totalorder %s20_s19, %s1096_s27  ;;  %p1102_p5 = scmp.lt.s32.totalorder %s1096_s27, %s1096_s27 }
   0xb   :  { %p1103_p6 = por %p1102_p5, %p1101_p4 }
   0xd   :  { %p1104_p7 = pnand %p1103_p6, %p1097_p3 }
   0xf   :  { %1107 = shalt.err (!%p1104_p7)
}
  0x10   :  { %s1135_s28 = smov 64   ;;  %s1136_s29 = smov 4  }
  0x11   :  { %25 = dma.hbm_to_vmem [thread:$0]  %s1275_s1, 6272, %s20_s19, [#allocation3], %s1135_s28, %s1135_s28, %s1136_s29  }
  0x12   :  { %1130 = dma.done.wait [#allocation3], 6272  }
  0x13   :  { %1131 = vsyncadd [#allocation3], 4294961024  ;;  %v1013_v0 = vld [vmem:[#allocation2 + $0x40] sm:$0xff]   ;;  %v1017_v4 = vld [vmem:[#allocation2 + $0x48] sm:$0xff]   ;;  %v1137_v23 = vmov 1983009808   ;;  %v59_v25 = vlaneseq }
  0x14   :  { %v1014_v1 = vld [vmem:[#allocation2] sm:$0xff]   ;;  %901 = vmatprep.subr.bf16.mxu0 %v1013_v0  ;;  %v1018_v5 = vld [vmem:[#allocation2 + $0x8] sm:$0xff]   ;;  %v1021_v8 = vld [vmem:[#allocation2 + $0x50] sm:$0xff]   ;;  %v57_v24 = vunpack.c.l.s4 %v1137_v23  ;;  %v1138_v47 = vmov 0.0   ;;  %vm1139_vm0 = vmmov 0   ;;  %vm536_vm1 = vcmask 130048  }
  0x15   :  { %v1015_v2 = vld [vmem:[#allocation2 + $0xc0] sm:$0xff]   ;;  %902 = vmatpush3.bf16.msra.mxu0 %v1014_v1  ;;  %v1019_v6 = vld [vmem:[#allocation2 + $0xc8] sm:$0xff]   ;;  %v1022_v9 = vld [vmem:[#allocation2 + $0x10] sm:$0xff]   ;;  %v60_v31 = vshrl.u32 %v59_v25, 7 }
  0x16   :  { %v1016_v3 = vld [vmem:[#allocation2 + $0x80] sm:$0xff]   ;;  %923 = vmatprep.subr.bf16.mxu1 %v1015_v2  ;;  %903 = vmatprep.subr.bf16.mxu0 %v1017_v4  ;;  %v1020_v7 = vld [vmem:[#allocation2 + $0x88] sm:$0xff]   ;;  %v1023_v10 = vld [vmem:[#allocation2 + $0xd0] sm:$0xff]   ;;  %v58_v30 = vunpack.c.0.s8 %v57_v24 }
  0x17   :  { %924 = vmatpush3.bf16.msra.mxu1 %v1016_v3  ;;  %v1024_v11 = vld [vmem:[#allocation2 + $0x90] sm:$0xff]   ;;  %v1025_v12 = vld [vmem:[#allocation2 + $0x58] sm:$0xff]   ;;  %v1029_v16 = vld [vmem:[#allocation2 + $0x60] sm:$0xff]  }
  0x18   :  { %925 = vmatprep.subr.bf16.mxu1 %v1019_v6  ;;  %v1026_v13 = vld [vmem:[#allocation2 + $0x18] sm:$0xff]   ;;  %v1030_v17 = vld [vmem:[#allocation2 + $0x20] sm:$0xff]   ;;  %v1033_v20 = vld [vmem:[#allocation2 + $0x68] sm:$0xff]   ;;  %v1185_v36 = vsub.s32 %v58_v30, %v60_v31 }
  0x19   :  { %904 = vmatpush3.bf16.msra.mxu0 %v1018_v5  ;;  %v1027_v14 = vld [vmem:[#allocation2 + $0xd8] sm:$0xff]   ;;  %v1031_v18 = vld [vmem:[#allocation2 + $0xe0] sm:$0xff]   ;;  %v1034_v21 = vld [vmem:[#allocation2 + $0x28] sm:$0xff]  }
  0x1a   :  { %905 = vmatprep.subr.bf16.mxu0 %v1021_v8  ;;  %v1028_v15 = vld [vmem:[#allocation2 + $0x98] sm:$0xff]   ;;  %v1032_v19 = vld [vmem:[#allocation2 + $0xa0] sm:$0xff]   ;;  %v1035_v22 = vld [vmem:[#allocation2 + $0xe8] sm:$0xff]  }
  0x1b   :  { %926 = vmatpush3.bf16.msra.mxu1 %v1020_v7  ;;  %v1036_v26 = vld [vmem:[#allocation2 + $0xa8] sm:$0xff]   ;;  %v1037_v27 = vld [vmem:[#allocation2 + $0x70] sm:$0xff]   ;;  %v1041_v33 = vld [vmem:[#allocation2 + $0x78] sm:$0xff]  }
  0x1c   :  { %927 = vmatprep.subr.bf16.mxu1 %v1023_v10  ;;  %v1038_v28 = vld [vmem:[#allocation2 + $0x30] sm:$0xff]   ;;  %v1042_v34 = vld [vmem:[#allocation2 + $0x38] sm:$0xff]   ;;  %v1049_v42 = vld [vmem:[#allocation2 + $0x140] sm:$0xff]  }
  0x1d   :  { %906 = vmatpush3.bf16.msra.mxu0 %v1022_v9  ;;  %v1039_v29 = vld [vmem:[#allocation2 + $0xf0] sm:$0xff]   ;;  %v1043_v35 = vld [vmem:[#allocation2 + $0xf8] sm:$0xff]   ;;  %v1052_v52 = vld [vmem:[#allocation2 + $0x100] sm:$0xff]  }
  0x1e   :  { %907 = vmatprep.subr.bf16.mxu0 %v1025_v12  ;;  %v1040_v32 = vld [vmem:[#allocation2 + $0xb0] sm:$0xff]   ;;  %v1046_v38 = vld [vmem:[%s1274_s0 + $0x1c] ss:$14 sps:$4 sm:$0xff]   ;;  %v1059_v63 = vld [vmem:[#allocation2 + $0x160] sm:$0xff]  }
  0x1f   :  { %928 = vmatpush3.bf16.msra.mxu1 %v1024_v11  ;;  %v1044_v37 = vld [vmem:[%s1274_s0] ss:$14 sps:$4 sm:$0xff]   ;;  %v1048_v39 = vld [vmem:[#allocation2 + $0xb8] sm:$0xff]   ;;  %v76_v41 = vrot.slane %v1046_v38, %v1185_v36  ;;  %v1050_v43 = vld [vmem:[%s1274_s0 + $0x4] ss:$14 sps:$4 sm:$0xff]  }
  0x20   :  { %929 = vmatprep.subr.bf16.mxu1 %v1027_v14  ;;  %v62_v40 = vrot.slane %v1044_v37, %v1185_v36  ;;  %v1051_v44 = vld [vmem:[%s1274_s0 + $0x20] ss:$14 sps:$4 sm:$0xff]   ;;  %v69_v48 = vrot.slane %v1050_v43, %v1185_v36  ;;  %v1057_v61 = vld [vmem:[#allocation2 + $0x158] sm:$0xff]   ;;  %v1071_v5 = vld [vmem:[%s1274_s0 + $0x24] ss:$14 sps:$4 sm:$0xff]  }
  0x21   :  { %908 = vmatpush3.bf16.msra.mxu0 %v1026_v13  ;;  %v83_v49 = vrot.slane %v1051_v44, %v1185_v36  ;;  %v1053_v55 = vld [vmem:[#allocation2 + $0x148] sm:$0xff]   ;;  %v1055_v59 = vld [vmem:[#allocation2 + $0x150] sm:$0xff]   ;;  %v1058_v62 = vld [vmem:[#allocation2 + $0x118] sm:$0xff]   ;;  %v112_v10 = vrot.slane %v1071_v5, %v1185_v36 }
  0x22   :  { %909 = vmatprep.subr.bf16.mxu0 %v1029_v16  ;;  %v85_v45 = vcombine.high %v62_v40, %v76_v41  ;;  %v84_v46 = vcombine.low %v62_v40, %v76_v41  ;;  %v1054_v58 = vld [vmem:[#allocation2 + $0x108] sm:$0xff]   ;;  %v1056_v60 = vld [vmem:[#allocation2 + $0x110] sm:$0xff]   ;;  %v1067_v0 = vld [vmem:[#allocation2 + $0x180] sm:$0xff]  }
  0x23   :  { %930 = vmatpush3.bf16.msra.mxu1 %v1028_v15  ;;  %v87_v53 = vcombine.high %v69_v48, %v83_v49  ;;  %v86_v54 = vcombine.low %v69_v48, %v83_v49  ;;  %v1060_v1 = vld [vmem:[#allocation2 + $0x120] sm:$0xff]   ;;  %v1068_v2 = vld [vmem:[%s1274_s0 + $0x8] ss:$14 sps:$4 sm:$0xff]   ;;  %v1070_v3 = vld [vmem:[%s1274_s0 + $0xc] ss:$14 sps:$4 sm:$0x33]  }
  0x24   :  { %931 = vmatprep.subr.bf16.mxu1 %v1031_v18  ;;  %v131_v50 = vpack.c.bf16 %v85_v45, %v85_v45  ;;  %v130_v51 = vpack.c.bf16 %v84_v46, %v84_v46  ;;  %v1061_v4 = vld [vmem:[#allocation2 + $0x168] sm:$0xff]   ;;  %v98_v7 = vrot.slane %v1068_v2, %v1185_v36  ;;  %v105_v8 = vrot.slane %v1070_v3, %v1185_v36  ;;  %v1063_v12 = vld [vmem:[#allocation2 + $0x170] sm:$0xff]   ;;  %v1065_v18 = vld [vmem:[#allocation2 + $0x178] sm:$0xff]  }
  0x25   :  { %910 = vmatpush3.bf16.msra.mxu0 %v1030_v17  ;;  %v133_v56 = vpack.c.bf16 %v87_v53, %v87_v53  ;;  %v132_v57 = vpack.c.bf16 %v86_v54, %v86_v54  ;;  %v1073_v6 = vld [vmem:[%s1274_s0 + $0x28] ss:$14 sps:$4 sm:$0x33]   ;;  %v1077_v25 = vld [vmem:[%s1277_s3 + $0x18] sm:$0xff]   ;;  %v841_v31 = vld [vmem:[%s1276_s2] ss:$0 sm:$0xff] }
  0x26   :  { %911 = vmatprep.subr.bf16.mxu0 %v1033_v20  ;;  %572 = vmatprep.mubr.bf16.mxu0 %v131_v50  ;;  %v1062_v9 = vld [vmem:[#allocation2 + $0x128] sm:$0xff]   ;;  %v119_v11 = vrot.slane %v1073_v6, %v1185_v36  ;;  %v121_v13 = vcombine.high %v98_v7, %v112_v10  ;;  %v1064_v17 = vld [vmem:[#allocation2 + $0x130] sm:$0xff]   ;;  %v1066_v20 = vld [vmem:[#allocation2 + $0x138] sm:$0xff]  }
  0x27   :  { %932 = vmatpush3.bf16.msra.mxu1 %v1032_v19  ;;  %612 = vmatprep.mubr.bf16.mxu1 %v133_v56  ;;  %v120_v19 = vcombine.low %v98_v7, %v112_v10  ;;  %v1075_v23 = vld [vmem:[%s1277_s3 + $0x8] sm:$0xff]   ;;  %v1076_v24 = vld [vmem:[%s1277_s3 + $0x10] sm:$0xff]   ;;  %v892_v56 = vld [vmem:[%s1278_s4] ss:$0 sm:$0xff] }
  0x28   :  { %933 = vmatprep.subr.bf16.mxu1 %v1035_v22  ;;  %v122_v14 = vcombine.low %v105_v8, %v119_v11  ;;  %v135_v15 = vpack.c.bf16 %v121_v13, %v121_v13  ;;  %v1074_v22 = vld [vmem:[%s1277_s3] sm:$0xff]  }
  0x29   :  { %912 = vmatpush3.bf16.msra.mxu0 %v1034_v21  ;;  %v134_v21 = vpack.c.bf16 %v120_v19, %v120_v19 }
  0x2a   :  { %913 = vmatprep.subr.bf16.mxu0 %v1037_v27  ;;  %v136_v16 = vpack.c.bf16 %v122_v14, %v122_v14  ;;  %v1079_v27 = vld [vmem:[%s1277_s3 + $0x28] sm:$0xff]  }
  0x2b   :  { %934 = vmatpush3.bf16.msra.mxu1 %v1036_v26  ;;  %v1078_v26 = vld [vmem:[%s1277_s3 + $0x20] sm:$0xff]  }
  0x2c   :  { %935 = vmatprep.subr.bf16.mxu1 %v1039_v29  ;;  %v1081_v29 = vld [vmem:[%s1277_s3 + $0x38] sm:$0xff]  }
  0x2d   :  { %914 = vmatpush3.bf16.msra.mxu0 %v1038_v28  ;;  %v1080_v28 = vld [vmem:[%s1277_s3 + $0x30] sm:$0xff]  }
  0x2e   :  { %915 = vmatprep.subr.bf16.mxu0 %v1041_v33 }
  0x2f   :  { %936 = vmatpush3.bf16.msra.mxu1 %v1040_v32 }
  0x30   :  { %937 = vmatprep.subr.bf16.mxu1 %v1043_v35 }
  0x31   :  { %916 = vmatpush3.bf16.msra.mxu0 %v1042_v34 }
  0x32   :  { %945 = vmatprep.subr.bf16.mxu0 %v1049_v42 }
  0x33   :  { %938 = vmatpush3.bf16.msra.mxu1 %v1048_v39 }
  0x34   :  { %978 = vmatprep.subr.bf16.mxu1 %v1138_v47  ;;  %573 = vmatmul.mubr.bf16.vlgmr.msra.gmra.mrb[0].mxu0 %v130_v51 }
  0x35   :  { %946 = vmatpush3.bf16.msra.mxu0 %v1052_v52  ;;  %652 = vmatprep.mubr.bf16.mxu0 %v135_v15 }
  0x36   :  { %947 = vmatprep.subr.bf16.mxu0 %v1053_v55  ;;  %613 = vmatmul.mubr.bf16.vlgmr.msra.gmra.mrb[0].mxu1 %v132_v57 }
  0x37   :  { %980 = vmatprep.mubr.msk.bf16.mxu1 %vm1139_vm0, %v1138_v47  ;;  %979 = vmatpush3.bf16.msra.mxu1 %v1067_v0 }
  0x38   :  { %984 = vmatprep.subr.bf16.mxu1 %v1138_v47 }
  0x39   :  { %948 = vmatpush3.bf16.msra.mxu0 %v1054_v58 }
  0x3a   :  { %949 = vmatprep.subr.bf16.mxu0 %v1055_v59 }
  0x3d   :  { %950 = vmatpush3.bf16.msra.mxu0 %v1056_v60 }
  0x3e   :  { %951 = vmatprep.subr.bf16.mxu0 %v1057_v61  ;;  %981 = vmatmul.mubr.msk.bf16.vlgmr.msra.gmra.mrb[4].mxu1 %vm536_vm1, %v136_v16 }
  0x3f   :  { %1000 = vmatprep.mubr.msk.bf16.mxu1 %vm1139_vm0, %v1138_v47  ;;  %985 = vmatpush3.bf16.msra.mxu1 %v1074_v22 }
  0x40   :  { %986 = vmatprep.subr.bf16.mxu1 %v1138_v47 }
  0x41   :  { %952 = vmatpush3.bf16.msra.mxu0 %v1058_v62 }
  0x42   :  { %953 = vmatprep.subr.bf16.mxu0 %v1059_v63 }
  0x43   :  { %987 = vmatpush3.bf16.msra.mxu1 %v1075_v23 }
  0x44   :  { %988 = vmatprep.subr.bf16.mxu1 %v1138_v47 }
  0x45   :  { %954 = vmatpush3.bf16.msra.mxu0 %v1060_v1 }
  0x46   :  { %955 = vmatprep.subr.bf16.mxu0 %v1061_v4 }
  0x47   :  { %989 = vmatpush3.bf16.msra.mxu1 %v1076_v24 }
  0x48   :  { %990 = vmatprep.subr.bf16.mxu1 %v1138_v47 }
  0x49   :  { %956 = vmatpush3.bf16.msra.mxu0 %v1062_v9 }
  0x4a   :  { %957 = vmatprep.subr.bf16.mxu0 %v1063_v12 }
  0x4b   :  { %991 = vmatpush3.bf16.msra.mxu1 %v1077_v25 }
  0x4c   :  { %992 = vmatprep.subr.bf16.mxu1 %v1138_v47 }
  0x4d   :  { %958 = vmatpush3.bf16.msra.mxu0 %v1064_v17 }
  0x4e   :  { %959 = vmatprep.subr.bf16.mxu0 %v1065_v18 }
  0x4f   :  { %993 = vmatpush3.bf16.msra.mxu1 %v1078_v26 }
  0x50   :  { %994 = vmatprep.subr.bf16.mxu1 %v1138_v47 }
  0x51   :  { %960 = vmatpush3.bf16.msra.mxu0 %v1066_v20 }
  0x53   :  { %995 = vmatpush3.bf16.msra.mxu1 %v1079_v27 }
  0x54   :  { %653 = vmatmul.mubr.bf16.vlgmr.msra.gmra.mrb[4].mxu0 %v134_v21  ;;  %996 = vmatprep.subr.bf16.mxu1 %v1138_v47 }
  0x57   :  { %997 = vmatpush3.bf16.msra.mxu1 %v1080_v28 }
  0x58   :  { %998 = vmatprep.subr.bf16.mxu1 %v1138_v47 }
  0x5b   :  { %999 = vmatpush3.bf16.msra.mxu1 %v1081_v29 }
 0x107   :  { %v917_v30 = vpop.f32.mrb[0].mxu0 }
 0x108   :  { %v918_v32 = vpop.f32.mrb[1].mxu0 }
 0x109   :  { %v919_v33 = vadd.f32 %v918_v32, %v917_v30  ;;  %v920_v34 = vpop.f32.mrb[2].mxu0  ;;  %v939_v35 = vpop.f32.mrb[0].mxu1 }
 0x10a   :  { %v921_v36 = vpop.f32.mrb[3].mxu0  ;;  %v940_v38 = vpop.f32.mrb[1].mxu1 }
 0x10b   :  { %v575_v37 = vadd.f32 %v919_v33, %v841_v31  ;;  %v941_v39 = vadd.f32 %v940_v38, %v939_v35  ;;  %v942_v40 = vpop.f32.mrb[2].mxu1 }
 0x10c   :  { %v943_v41 = vpop.f32.mrb[3].mxu1 }
 0x10d   :  { %v615_v42 = vadd.f32 %v941_v39, %v575_v37 }
 0x111   :  { %v694_v43 = vpop.f32.mrb[4].mxu1 }
 0x112   :  { %v982_v44 = vpop.f32.mrb[5].mxu1 }
 0x113   :  { %v697_v45 = vpop.f32.mrb[6].mxu1 }
 0x114   :  { %v983_v46 = vpop.f32.mrb[7].mxu1 }
 0x127   :  { %v961_v47 = vpop.f32.mrb[4].mxu0 }
 0x128   :  { %v962_v48 = vpop.f32.mrb[5].mxu0 }
 0x129   :  { %v963_v49 = vadd.f32 %v962_v48, %v961_v47  ;;  %v964_v50 = vpop.f32.mrb[6].mxu0 }
 0x12a   :  { %v965_v51 = vpop.f32.mrb[7].mxu0 }
 0x12b   :  { %v655_v52 = vadd.f32 %v963_v49, %v615_v42 }
 0x12d   :  { %v695_v53 = vadd.f32 %v694_v43, %v655_v52 }
 0x12f   :  { %v700_v54 = vmax.f32 %v695_v53, 0.0 }
 0x131   :  { %v701_v55 = vpack.c.bf16 %v700_v54, %v700_v54 }
 0x133   :  { %1001 = vmatmul.mubr.bf16.vlgmr.msra.gmra.mrb[8].mxu1 %v701_v55 }
 0x206   :  { %v807_v57 = vpop.f32.mrb[8].mxu1 }
 0x207   :  { %v808_v58 = vadd.f32 %v892_v56, %v807_v57  ;;  %v1002_v59 = vpop.f32.mrb[9].mxu1 }
 0x208   :  { %v810_v60 = vpop.f32.mrb[10].mxu1 }
 0x209   :  { %813 = vmax.xlane.f32.xlu0 %v808_v58  ;;  %v1003_v61 = vpop.f32.mrb[11].mxu1 }
 0x296   :  { %v814_v62 = vpop.xlane.xlu0 %813 }
 0x297   :  { %v815_v63 = vsub.f32 %v808_v58, %v814_v62 }
 0x299   :  { %v816_v0 = vmul.f32 1.442695, %v815_v63 }
 0x29b   :  { %1082 = vpow2.f32 %v816_v0 }
 0x2a5   :  { %v1083_v1 = vpop.eup %1082 }
 0x2a6   :  { %818 = vadd.xlane.f32.xlu0 %v1083_v1 }
 0x333   :  { %v819_v2 = vpop.xlane.xlu0 %818 }
 0x334   :  { %1084 = vlog2.f32 %v819_v2 }
 0x33e   :  { %v1085_v3 = vpop.eup %1084 }
 0x33f   :  { %v821_v4 = vmul.f32 0.6931472, %v1085_v3 }
 0x341   :  { %v822_v5 = vsub.f32 %v815_v63, %v821_v4 }
 0x343   :  { %823 = vst [vmem:[#allocation5] sm:$0xff] %v822_v5 }
 0x344   :  { %828 = vsyncadd [#allocation4], 96  ;;  %s1140_s4 = smov [#allocation5]  }
 0x345   :  { %s829_s13 = sshll.u32 %s1140_s4, 4  ;;  %s830_s13 = int_to_ptr.vmem [resolvable:$true] %s829_s13 }
 0x346   :  { %s1108_s14 = scalar_lea.vmem %s830_s13, 32  ;;  %s1112_s15 = scalar_lea.vmem %s830_s13, 128 }
 0x347   :  { %p1109_p8 = scmp.ne.s32.totalorder %s830_s13, %s1108_s14  ;;  %p1113_p9 = scmp.lt.s32.totalorder %s830_s13, %s830_s13 }
 0x348   :  { %p1114_p10 = scmp.lt.s32.totalorder %s1112_s15, %s1108_s14 }
 0x34a   :  { %p1115_p11 = por %p1114_p10, %p1113_p9 }
 0x34c   :  { %p1116_p12 = pnand %p1115_p11, %p1109_p8 }
 0x34e   :  { %1119 = shalt.err (!%p1116_p12)
}
 0x34f   :  { %s1120_s18 = scalar_lea.hbm %s1279_s5, 32 }
 0x350   :  { %p1121_p13 = scmp.ne.s32.totalorder %s1279_s5, %s1120_s18  ;;  %p1124_p0 = scmp.lt.u32.totalorder %s1120_s18, %s1279_s5 }
 0x352   :  { %p1126_p1 = pnand %p1124_p0, %p1121_p13 }
 0x354   :  { %1129 = shalt.err (!%p1126_p1)
}
 0x355   :  { %s1141_s22 = smov 32   ;;  %s1142_s23 = smov 2  }
 0x356   :  { %835 = dma.vmem_to_hbm [thread:$0]  %s830_s13, 32, %s1279_s5, [#allocation4], %s1141_s22, %s1141_s22, %s1142_s23  }
 0x357   :  { %1132 = dma.done.wait [#allocation4], 128  }
 0x358   :  { %1133 = vsyncadd [#allocation4], 4294967168 }
 0x359   :  { %839 = vsyncpa [#allocation3], 1 }
 0x35a   :  { %840 = vsyncpa [#allocation4], 1 }

</bundles_post_ra>
